<compile_context>
chip_gen: v6e
topology: v6e:2x2x1
jax: 0.10.0
libtpu: 0.0.40
codegen_flags: <defaults>
</compile_context>

<pallas_src>
import functools

import jax
import jax.numpy as jnp
from jax import lax
from jax.experimental import pallas as pl
from jax.experimental.pallas import tpu as pltpu


def _pair_loss_sum(a, b, inv_t, use_bf16_matmul):
    """Sum over all 2B rows of -log(pos / denom) for one (out_1, out_2) pair.

    a, b : [B, D] float32 raw features. Returns a [1, 1] float32 array.
    """
    eps2 = 1e-24  # (F.normalize eps = 1e-12) ** 2

    # F.normalize(x, dim=1) == x / max(||x||, eps) == x * rsqrt(max(||x||^2, eps^2))
    na = a * lax.rsqrt(jnp.maximum(jnp.sum(a * a, axis=1, keepdims=True), eps2))
    nb = b * lax.rsqrt(jnp.maximum(jnp.sum(b * b, axis=1, keepdims=True), eps2))

    if use_bf16_matmul:
        ma = na.astype(jnp.bfloat16)
        mb = nb.astype(jnp.bfloat16)
    else:
        ma, mb = na, nb

    # NT-form Gram blocks (contract the feature axis): no [2B, D] concat,
    # no explicit transpose, no [2B, 2B] materialization.
    nt = (((1,), (1,)), ((), ()))
    e_aa = jnp.exp(lax.dot_general(ma, ma, nt, preferred_element_type=jnp.float32) * inv_t)
    e_ab = jnp.exp(lax.dot_general(ma, mb, nt, preferred_element_type=jnp.float32) * inv_t)
    e_ba = jnp.exp(lax.dot_general(mb, ma, nt, preferred_element_type=jnp.float32) * inv_t)
    e_bb = jnp.exp(lax.dot_general(mb, mb, nt, preferred_element_type=jnp.float32) * inv_t)

    # Off-diagonal row sums = full row sum - per-row diagonal term
    # exp(||row||^2 / T)  (computed per row, not a compile-time constant).
    diag_a = jnp.exp(jnp.sum(na * na, axis=1, keepdims=True) * inv_t)  # [B, 1]
    diag_b = jnp.exp(jnp.sum(nb * nb, axis=1, keepdims=True) * inv_t)  # [B, 1]

    denom_a = (jnp.sum(e_aa, axis=1, keepdims=True)
               + jnp.sum(e_ab, axis=1, keepdims=True) - diag_a)        # [B, 1]
    denom_b = (jnp.sum(e_ba, axis=1, keepdims=True)
               + jnp.sum(e_bb, axis=1, keepdims=True) - diag_b)        # [B, 1]

    # -log(exp(pos)/denom) = log(denom) - pos  (skip the exp/log round-trip)
    pos = jnp.sum(na * nb, axis=1, keepdims=True) * inv_t              # [B, 1]

    per_row = (jnp.log(denom_a) + jnp.log(denom_b)) - 2.0 * pos        # [B, 1]
    return jnp.sum(per_row, axis=0, keepdims=True)                     # [1, 1]


def _dense_loss_kernel(x1_ref, y1_ref, x2_ref, y2_ref, loss_ref, *,
                       temperature, use_bf16_matmul):
    """Fused Dense_Loss forward: both contrastive losses in one kernel.

    x*_ref, y*_ref : [B, D] VMEM tiles (raw features)
    loss_ref       : [1, 1] VMEM output = 0.5 * (loss1 + loss2)
    """
    inv_t = 1.0 / float(temperature)
    b = x1_ref.shape[0]
    inv_2b = 1.0 / float(2 * b)

    x1 = x1_ref[...].astype(jnp.float32)
    y1 = y1_ref[...].astype(jnp.float32)
    x2 = x2_ref[...].astype(jnp.float32)
    y2 = y2_ref[...].astype(jnp.float32)

    s1 = _pair_loss_sum(x1, y1, inv_t, use_bf16_matmul)  # [1, 1] sum over 2B rows
    s2 = _pair_loss_sum(x2, y2, inv_t, use_bf16_matmul)  # [1, 1]

    # loss_k = s_k / (2B); output = 0.5 * (loss1 + loss2)
    loss_ref[...] = 0.5 * (s1 + s2) * inv_2b


def dense_loss_pallas(x, y, temperature=0.7, use_bf16_matmul=False):
    """Forward pass of Dense_Loss: x = (x1, x2), y = (y1, y2), all [B, D]."""
    x1, x2 = x
    y1, y2 = y
    # y.detach() -> stop_gradient (forward-value no-op)
    y1 = lax.stop_gradient(y1)
    y2 = lax.stop_gradient(y2)

    B, D = x1.shape
    # TODO(synk): PyTorch normalizes along dim=1 *before* flatten(1) for >2-D
    # inputs; only 2-D [B, D] features are handled here.

    kernel = functools.partial(
        _dense_loss_kernel,
        temperature=float(temperature),
        use_bf16_matmul=bool(use_bf16_matmul),
    )
    feat_spec = pl.BlockSpec((B, D), lambda i: (0, 0))
    loss = pl.pallas_call(
        kernel,
        out_shape=jax.ShapeDtypeStruct((1, 1), jnp.float32),
        grid=(1,),
        in_specs=[feat_spec, feat_spec, feat_spec, feat_spec],
        out_specs=pl.BlockSpec((1, 1), lambda i: (0, 0)),
        compiler_params=pltpu.CompilerParams(dimension_semantics=("arbitrary",)),
    )(x1, y1, x2, y2)
    return loss[0, 0]


# ----------------------- pure-JAX reference for sanity -----------------------
def _contrastive_loss_ref(out_1, out_2, temperature=0.7):
    o1 = out_1.astype(jnp.float32)
    o2 = out_2.astype(jnp.float32)
    n1 = o1 / jnp.maximum(jnp.linalg.norm(o1, axis=1, keepdims=True), 1e-12)
    n2 = o2 / jnp.maximum(jnp.linalg.norm(o2, axis=1, keepdims=True), 1e-12)
    out = jnp.concatenate([n1, n2], axis=0)
    sim = jnp.exp(out @ out.T / temperature)
    n2b = out.shape[0]
    mask = 1.0 - jnp.eye(n2b, dtype=jnp.float32)
    denom = jnp.sum(sim * mask, axis=-1)
    pos = jnp.exp(jnp.sum(n1 * n2, axis=-1) / temperature)
    pos = jnp.concatenate([pos, pos], axis=0)
    return jnp.mean(-jnp.log(pos / denom))


def _dense_loss_ref(x, y, temperature=0.7):
    x1, x2 = x
    y1, y2 = y
    return 0.5 * (
        _contrastive_loss_ref(x1, y1, temperature)
        + _contrastive_loss_ref(x2, y2, temperature)
    )


if __name__ == "__main__":
    B, D = 8, 128  # small batch / feature dim
    temperature = 0.7

    key = jax.random.PRNGKey(0)
    k1, k2, k3, k4 = jax.random.split(key, 4)
    x1 = jax.random.normal(k1, (B, D), dtype=jnp.float32)
    x2 = jax.random.normal(k2, (B, D), dtype=jnp.float32)
    y1 = jax.random.normal(k3, (B, D), dtype=jnp.float32)
    y2 = jax.random.normal(k4, (B, D), dtype=jnp.float32)

    loss = dense_loss_pallas((x1, x2), (y1, y2), temperature)
    loss = jax.block_until_ready(loss)

    ref = jax.block_until_ready(_dense_loss_ref((x1, x2), (y1, y2), temperature))
    assert jnp.allclose(loss, ref, rtol=1e-3, atol=1e-4), (loss, ref)

    print("KERNEL_OK")
</pallas_src>

<mosaic_0001>
module attributes {stable_mosaic.version = 11 : i64} {
  func.func @_dense_loss_kernel(%arg0: i32, %arg1: memref<8x128xf32, #tpu.memory_space<vmem>>, %arg2: memref<8x128xf32, #tpu.memory_space<vmem>>, %arg3: memref<8x128xf32, #tpu.memory_space<vmem>>, %arg4: memref<8x128xf32, #tpu.memory_space<vmem>>, %arg5: memref<1x1xf32, #tpu.memory_space<vmem>>) attributes {dimension_semantics = [#tpu.dimension_semantics<arbitrary>], iteration_bounds = array<i64: 1>, scalar_prefetch = 0 : i64, scratch_operands = 0 : i64, tpu.core_type = #tpu.core_type<tc>, window_params = [{pipeline_mode = #tpu.pipeline_mode<synchronous>, transform_indices = @transform_0, window_bounds = array<i64: 8, 128>}, {pipeline_mode = #tpu.pipeline_mode<synchronous>, transform_indices = @transform_1, window_bounds = array<i64: 8, 128>}, {pipeline_mode = #tpu.pipeline_mode<synchronous>, transform_indices = @transform_2, window_bounds = array<i64: 8, 128>}, {pipeline_mode = #tpu.pipeline_mode<synchronous>, transform_indices = @transform_3, window_bounds = array<i64: 8, 128>}, {pipeline_mode = #tpu.pipeline_mode<synchronous>, transform_indices = @transform_4, window_bounds = array<i64: 1, 1>}]} {
    %c0 = arith.constant 0 : index
    %c0_0 = arith.constant 0 : index
    %0 = vector.load %arg1[%c0, %c0_0] : memref<8x128xf32, #tpu.memory_space<vmem>>, vector<8x128xf32>
    %c0_1 = arith.constant 0 : index
    %c0_2 = arith.constant 0 : index
    %1 = vector.load %arg2[%c0_1, %c0_2] : memref<8x128xf32, #tpu.memory_space<vmem>>, vector<8x128xf32>
    %c0_3 = arith.constant 0 : index
    %c0_4 = arith.constant 0 : index
    %2 = vector.load %arg3[%c0_3, %c0_4] : memref<8x128xf32, #tpu.memory_space<vmem>>, vector<8x128xf32>
    %c0_5 = arith.constant 0 : index
    %c0_6 = arith.constant 0 : index
    %3 = vector.load %arg4[%c0_5, %c0_6] : memref<8x128xf32, #tpu.memory_space<vmem>>, vector<8x128xf32>
    %4 = arith.mulf %0, %0 : vector<8x128xf32>
    %cst = arith.constant dense<0.000000e+00> : vector<8xf32>
    %5 = vector.multi_reduction <add>, %4, %cst [1] : vector<8x128xf32> to vector<8xf32>
    %6 = vector.shape_cast %5 : vector<8xf32> to vector<8x1xf32>
    %cst_7 = arith.constant 1.000000e-24 : f32
    %7 = vector.broadcast %cst_7 : f32 to vector<8x1xf32>
    %8 = arith.maximumf %6, %7 : vector<8x1xf32>
    %9 = math.rsqrt %8 : vector<8x1xf32>
    %10 = vector.broadcast %9 : vector<8x1xf32> to vector<8x128xf32>
    %11 = arith.mulf %0, %10 : vector<8x128xf32>
    %12 = arith.mulf %1, %1 : vector<8x128xf32>
    %cst_8 = arith.constant dense<0.000000e+00> : vector<8xf32>
    %13 = vector.multi_reduction <add>, %12, %cst_8 [1] : vector<8x128xf32> to vector<8xf32>
    %14 = vector.shape_cast %13 : vector<8xf32> to vector<8x1xf32>
    %cst_9 = arith.constant 1.000000e-24 : f32
    %15 = vector.broadcast %cst_9 : f32 to vector<8x1xf32>
    %16 = arith.maximumf %14, %15 : vector<8x1xf32>
    %17 = math.rsqrt %16 : vector<8x1xf32>
    %18 = vector.broadcast %17 : vector<8x1xf32> to vector<8x128xf32>
    %19 = arith.mulf %1, %18 : vector<8x128xf32>
    %cst_10 = arith.constant dense<0.000000e+00> : vector<8x8xf32>
    %20 = tpu.matmul %11, %11, %cst_10 {dimension_numbers = #tpu.dot_dimension_numbers<[1], [1], [0], [0], [0, 0, 1, 0], [], []>} : vector<8x128xf32>, vector<8x128xf32>, vector<8x8xf32> -> vector<8x8xf32>
    %cst_11 = arith.constant 1.42857146 : f32
    %21 = vector.broadcast %cst_11 : f32 to vector<8x8xf32>
    %22 = arith.mulf %20, %21 : vector<8x8xf32>
    %23 = math.exp %22 : vector<8x8xf32>
    %cst_12 = arith.constant dense<0.000000e+00> : vector<8x8xf32>
    %24 = tpu.matmul %11, %19, %cst_12 {dimension_numbers = #tpu.dot_dimension_numbers<[1], [1], [0], [0], [0, 0, 1, 0], [], []>} : vector<8x128xf32>, vector<8x128xf32>, vector<8x8xf32> -> vector<8x8xf32>
    %cst_13 = arith.constant 1.42857146 : f32
    %25 = vector.broadcast %cst_13 : f32 to vector<8x8xf32>
    %26 = arith.mulf %24, %25 : vector<8x8xf32>
    %27 = math.exp %26 : vector<8x8xf32>
    %cst_14 = arith.constant dense<0.000000e+00> : vector<8x8xf32>
    %28 = tpu.matmul %19, %11, %cst_14 {dimension_numbers = #tpu.dot_dimension_numbers<[1], [1], [0], [0], [0, 0, 1, 0], [], []>} : vector<8x128xf32>, vector<8x128xf32>, vector<8x8xf32> -> vector<8x8xf32>
    %cst_15 = arith.constant 1.42857146 : f32
    %29 = vector.broadcast %cst_15 : f32 to vector<8x8xf32>
    %30 = arith.mulf %28, %29 : vector<8x8xf32>
    %31 = math.exp %30 : vector<8x8xf32>
    %cst_16 = arith.constant dense<0.000000e+00> : vector<8x8xf32>
    %32 = tpu.matmul %19, %19, %cst_16 {dimension_numbers = #tpu.dot_dimension_numbers<[1], [1], [0], [0], [0, 0, 1, 0], [], []>} : vector<8x128xf32>, vector<8x128xf32>, vector<8x8xf32> -> vector<8x8xf32>
    %cst_17 = arith.constant 1.42857146 : f32
    %33 = vector.broadcast %cst_17 : f32 to vector<8x8xf32>
    %34 = arith.mulf %32, %33 : vector<8x8xf32>
    %35 = math.exp %34 : vector<8x8xf32>
    %36 = arith.mulf %11, %11 : vector<8x128xf32>
    %cst_18 = arith.constant dense<0.000000e+00> : vector<8xf32>
    %37 = vector.multi_reduction <add>, %36, %cst_18 [1] : vector<8x128xf32> to vector<8xf32>
    %38 = vector.shape_cast %37 : vector<8xf32> to vector<8x1xf32>
    %cst_19 = arith.constant 1.42857146 : f32
    %39 = vector.broadcast %cst_19 : f32 to vector<8x1xf32>
    %40 = arith.mulf %38, %39 : vector<8x1xf32>
    %41 = math.exp %40 : vector<8x1xf32>
    %42 = arith.mulf %19, %19 : vector<8x128xf32>
    %cst_20 = arith.constant dense<0.000000e+00> : vector<8xf32>
    %43 = vector.multi_reduction <add>, %42, %cst_20 [1] : vector<8x128xf32> to vector<8xf32>
    %44 = vector.shape_cast %43 : vector<8xf32> to vector<8x1xf32>
    %cst_21 = arith.constant 1.42857146 : f32
    %45 = vector.broadcast %cst_21 : f32 to vector<8x1xf32>
    %46 = arith.mulf %44, %45 : vector<8x1xf32>
    %47 = math.exp %46 : vector<8x1xf32>
    %cst_22 = arith.constant dense<0.000000e+00> : vector<8xf32>
    %48 = vector.multi_reduction <add>, %23, %cst_22 [1] : vector<8x8xf32> to vector<8xf32>
    %49 = vector.shape_cast %48 : vector<8xf32> to vector<8x1xf32>
    %cst_23 = arith.constant dense<0.000000e+00> : vector<8xf32>
    %50 = vector.multi_reduction <add>, %27, %cst_23 [1] : vector<8x8xf32> to vector<8xf32>
    %51 = vector.shape_cast %50 : vector<8xf32> to vector<8x1xf32>
    %52 = arith.addf %49, %51 : vector<8x1xf32>
    %53 = arith.subf %52, %41 : vector<8x1xf32>
    %cst_24 = arith.constant dense<0.000000e+00> : vector<8xf32>
    %54 = vector.multi_reduction <add>, %31, %cst_24 [1] : vector<8x8xf32> to vector<8xf32>
    %55 = vector.shape_cast %54 : vector<8xf32> to vector<8x1xf32>
    %cst_25 = arith.constant dense<0.000000e+00> : vector<8xf32>
    %56 = vector.multi_reduction <add>, %35, %cst_25 [1] : vector<8x8xf32> to vector<8xf32>
    %57 = vector.shape_cast %56 : vector<8xf32> to vector<8x1xf32>
    %58 = arith.addf %55, %57 : vector<8x1xf32>
    %59 = arith.subf %58, %47 : vector<8x1xf32>
    %60 = arith.mulf %11, %19 : vector<8x128xf32>
    %cst_26 = arith.constant dense<0.000000e+00> : vector<8xf32>
    %61 = vector.multi_reduction <add>, %60, %cst_26 [1] : vector<8x128xf32> to vector<8xf32>
    %62 = vector.shape_cast %61 : vector<8xf32> to vector<8x1xf32>
    %cst_27 = arith.constant 1.42857146 : f32
    %63 = vector.broadcast %cst_27 : f32 to vector<8x1xf32>
    %64 = arith.mulf %62, %63 : vector<8x1xf32>
    %65 = math.log %53 : vector<8x1xf32>
    %66 = math.log %59 : vector<8x1xf32>
    %67 = arith.addf %65, %66 : vector<8x1xf32>
    %cst_28 = arith.constant 2.000000e+00 : f32
    %68 = vector.broadcast %cst_28 : f32 to vector<8x1xf32>
    %69 = arith.mulf %68, %64 : vector<8x1xf32>
    %70 = arith.subf %67, %69 : vector<8x1xf32>
    %cst_29 = arith.constant dense<0.000000e+00> : vector<1xf32>
    %71 = vector.multi_reduction <add>, %70, %cst_29 [0] : vector<8x1xf32> to vector<1xf32>
    %72 = vector.shape_cast %71 : vector<1xf32> to vector<1x1xf32>
    %73 = arith.mulf %2, %2 : vector<8x128xf32>
    %cst_30 = arith.constant dense<0.000000e+00> : vector<8xf32>
    %74 = vector.multi_reduction <add>, %73, %cst_30 [1] : vector<8x128xf32> to vector<8xf32>
    %75 = vector.shape_cast %74 : vector<8xf32> to vector<8x1xf32>
    %cst_31 = arith.constant 1.000000e-24 : f32
    %76 = vector.broadcast %cst_31 : f32 to vector<8x1xf32>
    %77 = arith.maximumf %75, %76 : vector<8x1xf32>
    %78 = math.rsqrt %77 : vector<8x1xf32>
    %79 = vector.broadcast %78 : vector<8x1xf32> to vector<8x128xf32>
    %80 = arith.mulf %2, %79 : vector<8x128xf32>
    %81 = arith.mulf %3, %3 : vector<8x128xf32>
    %cst_32 = arith.constant dense<0.000000e+00> : vector<8xf32>
    %82 = vector.multi_reduction <add>, %81, %cst_32 [1] : vector<8x128xf32> to vector<8xf32>
    %83 = vector.shape_cast %82 : vector<8xf32> to vector<8x1xf32>
    %cst_33 = arith.constant 1.000000e-24 : f32
    %84 = vector.broadcast %cst_33 : f32 to vector<8x1xf32>
    %85 = arith.maximumf %83, %84 : vector<8x1xf32>
    %86 = math.rsqrt %85 : vector<8x1xf32>
    %87 = vector.broadcast %86 : vector<8x1xf32> to vector<8x128xf32>
    %88 = arith.mulf %3, %87 : vector<8x128xf32>
    %cst_34 = arith.constant dense<0.000000e+00> : vector<8x8xf32>
    %89 = tpu.matmul %80, %80, %cst_34 {dimension_numbers = #tpu.dot_dimension_numbers<[1], [1], [0], [0], [0, 0, 1, 0], [], []>} : vector<8x128xf32>, vector<8x128xf32>, vector<8x8xf32> -> vector<8x8xf32>
    %cst_35 = arith.constant 1.42857146 : f32
    %90 = vector.broadcast %cst_35 : f32 to vector<8x8xf32>
    %91 = arith.mulf %89, %90 : vector<8x8xf32>
    %92 = math.exp %91 : vector<8x8xf32>
    %cst_36 = arith.constant dense<0.000000e+00> : vector<8x8xf32>
    %93 = tpu.matmul %80, %88, %cst_36 {dimension_numbers = #tpu.dot_dimension_numbers<[1], [1], [0], [0], [0, 0, 1, 0], [], []>} : vector<8x128xf32>, vector<8x128xf32>, vector<8x8xf32> -> vector<8x8xf32>
    %cst_37 = arith.constant 1.42857146 : f32
    %94 = vector.broadcast %cst_37 : f32 to vector<8x8xf32>
    %95 = arith.mulf %93, %94 : vector<8x8xf32>
    %96 = math.exp %95 : vector<8x8xf32>
    %cst_38 = arith.constant dense<0.000000e+00> : vector<8x8xf32>
    %97 = tpu.matmul %88, %80, %cst_38 {dimension_numbers = #tpu.dot_dimension_numbers<[1], [1], [0], [0], [0, 0, 1, 0], [], []>} : vector<8x128xf32>, vector<8x128xf32>, vector<8x8xf32> -> vector<8x8xf32>
    %cst_39 = arith.constant 1.42857146 : f32
    %98 = vector.broadcast %cst_39 : f32 to vector<8x8xf32>
    %99 = arith.mulf %97, %98 : vector<8x8xf32>
    %100 = math.exp %99 : vector<8x8xf32>
    %cst_40 = arith.constant dense<0.000000e+00> : vector<8x8xf32>
    %101 = tpu.matmul %88, %88, %cst_40 {dimension_numbers = #tpu.dot_dimension_numbers<[1], [1], [0], [0], [0, 0, 1, 0], [], []>} : vector<8x128xf32>, vector<8x128xf32>, vector<8x8xf32> -> vector<8x8xf32>
    %cst_41 = arith.constant 1.42857146 : f32
    %102 = vector.broadcast %cst_41 : f32 to vector<8x8xf32>
    %103 = arith.mulf %101, %102 : vector<8x8xf32>
    %104 = math.exp %103 : vector<8x8xf32>
    %105 = arith.mulf %80, %80 : vector<8x128xf32>
    %cst_42 = arith.constant dense<0.000000e+00> : vector<8xf32>
    %106 = vector.multi_reduction <add>, %105, %cst_42 [1] : vector<8x128xf32> to vector<8xf32>
    %107 = vector.shape_cast %106 : vector<8xf32> to vector<8x1xf32>
    %cst_43 = arith.constant 1.42857146 : f32
    %108 = vector.broadcast %cst_43 : f32 to vector<8x1xf32>
    %109 = arith.mulf %107, %108 : vector<8x1xf32>
    %110 = math.exp %109 : vector<8x1xf32>
    %111 = arith.mulf %88, %88 : vector<8x128xf32>
    %cst_44 = arith.constant dense<0.000000e+00> : vector<8xf32>
    %112 = vector.multi_reduction <add>, %111, %cst_44 [1] : vector<8x128xf32> to vector<8xf32>
    %113 = vector.shape_cast %112 : vector<8xf32> to vector<8x1xf32>
    %cst_45 = arith.constant 1.42857146 : f32
    %114 = vector.broadcast %cst_45 : f32 to vector<8x1xf32>
    %115 = arith.mulf %113, %114 : vector<8x1xf32>
    %116 = math.exp %115 : vector<8x1xf32>
    %cst_46 = arith.constant dense<0.000000e+00> : vector<8xf32>
    %117 = vector.multi_reduction <add>, %92, %cst_46 [1] : vector<8x8xf32> to vector<8xf32>
    %118 = vector.shape_cast %117 : vector<8xf32> to vector<8x1xf32>
    %cst_47 = arith.constant dense<0.000000e+00> : vector<8xf32>
    %119 = vector.multi_reduction <add>, %96, %cst_47 [1] : vector<8x8xf32> to vector<8xf32>
    %120 = vector.shape_cast %119 : vector<8xf32> to vector<8x1xf32>
    %121 = arith.addf %118, %120 : vector<8x1xf32>
    %122 = arith.subf %121, %110 : vector<8x1xf32>
    %cst_48 = arith.constant dense<0.000000e+00> : vector<8xf32>
    %123 = vector.multi_reduction <add>, %100, %cst_48 [1] : vector<8x8xf32> to vector<8xf32>
    %124 = vector.shape_cast %123 : vector<8xf32> to vector<8x1xf32>
    %cst_49 = arith.constant dense<0.000000e+00> : vector<8xf32>
    %125 = vector.multi_reduction <add>, %104, %cst_49 [1] : vector<8x8xf32> to vector<8xf32>
    %126 = vector.shape_cast %125 : vector<8xf32> to vector<8x1xf32>
    %127 = arith.addf %124, %126 : vector<8x1xf32>
    %128 = arith.subf %127, %116 : vector<8x1xf32>
    %129 = arith.mulf %80, %88 : vector<8x128xf32>
    %cst_50 = arith.constant dense<0.000000e+00> : vector<8xf32>
    %130 = vector.multi_reduction <add>, %129, %cst_50 [1] : vector<8x128xf32> to vector<8xf32>
    %131 = vector.shape_cast %130 : vector<8xf32> to vector<8x1xf32>
    %cst_51 = arith.constant 1.42857146 : f32
    %132 = vector.broadcast %cst_51 : f32 to vector<8x1xf32>
    %133 = arith.mulf %131, %132 : vector<8x1xf32>
    %134 = math.log %122 : vector<8x1xf32>
    %135 = math.log %128 : vector<8x1xf32>
    %136 = arith.addf %134, %135 : vector<8x1xf32>
    %cst_52 = arith.constant 2.000000e+00 : f32
    %137 = vector.broadcast %cst_52 : f32 to vector<8x1xf32>
    %138 = arith.mulf %137, %133 : vector<8x1xf32>
    %139 = arith.subf %136, %138 : vector<8x1xf32>
    %cst_53 = arith.constant dense<0.000000e+00> : vector<1xf32>
    %140 = vector.multi_reduction <add>, %139, %cst_53 [0] : vector<8x1xf32> to vector<1xf32>
    %141 = vector.shape_cast %140 : vector<1xf32> to vector<1x1xf32>
    %142 = arith.addf %72, %141 : vector<1x1xf32>
    %cst_54 = arith.constant 5.000000e-01 : f32
    %143 = vector.broadcast %cst_54 : f32 to vector<1x1xf32>
    %144 = arith.mulf %143, %142 : vector<1x1xf32>
    %cst_55 = arith.constant 6.250000e-02 : f32
    %145 = vector.broadcast %cst_55 : f32 to vector<1x1xf32>
    %146 = arith.mulf %144, %145 : vector<1x1xf32>
    %c0_56 = arith.constant 0 : index
    %c0_57 = arith.constant 0 : index
    %147 = vector.load %arg5[%c0_56, %c0_57] : memref<1x1xf32, #tpu.memory_space<vmem>>, vector<1x1xf32>
    tpu.vector_store %arg5[%c0_56, %c0_57], %146 {strides = array<i32>} : memref<1x1xf32, #tpu.memory_space<vmem>>, vector<1x1xf32>,
    return
  }
  func.func @transform_0(%arg0: i32) -> (i32, i32) {
    %c0_i32 = arith.constant 0 : i32
    %c0_i32_0 = arith.constant 0 : i32
    %c0_i32_1 = arith.constant 0 : i32
    return %c0_i32, %c0_i32_0 : i32, i32
  }
  func.func @transform_1(%arg0: i32) -> (i32, i32) {
    %c0_i32 = arith.constant 0 : i32
    %c0_i32_0 = arith.constant 0 : i32
    %c0_i32_1 = arith.constant 0 : i32
    return %c0_i32, %c0_i32_0 : i32, i32
  }
  func.func @transform_2(%arg0: i32) -> (i32, i32) {
    %c0_i32 = arith.constant 0 : i32
    %c0_i32_0 = arith.constant 0 : i32
    %c0_i32_1 = arith.constant 0 : i32
    return %c0_i32, %c0_i32_0 : i32, i32
  }
  func.func @transform_3(%arg0: i32) -> (i32, i32) {
    %c0_i32 = arith.constant 0 : i32
    %c0_i32_0 = arith.constant 0 : i32
    %c0_i32_1 = arith.constant 0 : i32
    return %c0_i32, %c0_i32_0 : i32, i32
  }
  func.func @transform_4(%arg0: i32) -> (i32, i32) {
    %c0_i32 = arith.constant 0 : i32
    %c0_i32_0 = arith.constant 0 : i32
    %c0_i32_1 = arith.constant 0 : i32
    return %c0_i32, %c0_i32_0 : i32, i32
  }
}

</mosaic_0001>

<bundles_post_ra>
// kernel: tpu_custom_call.1
= control target key start
LH: loop header
LB: loop body
LE: loop exit
PB: predicated region body
PF: predicated region fallthrough
CT: control target
= control target key end

     0   :  { %9 = vsyncpa [#allocation3], 0  ;;  %s1070_s0 = inlined_call_operand.hbm [shape: f32[8,128], index: 0, kind: input, shape index: {}]   ;;  %s1071_s1 = inlined_call_operand.hbm [shape: f32[8,128], index: 1, kind: input, shape index: {}]   ;;  %s1072_s2 = inlined_call_operand.hbm [shape: f32[8,128], index: 2, kind: input, shape index: {}]   ;;  %s1073_s3 = inlined_call_operand.hbm [shape: f32[8,128], index: 3, kind: input, shape index: {}]   ;;  %s1074_s4 = inlined_call_operand.hbm [shape: f32[1,1], index: 4, kind: output, shape index: {}]  }
   0x1   :  { %10 = vsyncpa [#allocation6], 0 }
   0x2   :  { %11 = vsyncpa [#allocation9], 0 }
   0x3   :  { %12 = vsyncpa [#allocation4], 0  ;;  %s1001_s15 = smov [#allocation5]   ;;  %s1002_s17 = smov [#allocation2]  }
   0x4   :  { %s29_s16 = sshll.u32 %s1001_s15, 4  ;;  %s19_s18 = sshll.u32 %s1002_s17, 4  ;;  %s30_s16 = int_to_ptr.vmem [resolvable:$true] %s29_s16  ;;  %s20_s18 = int_to_ptr.vmem [resolvable:$true] %s19_s18 }
   0x5   :  { %s901_s19 = scalar_lea.vmem %s30_s16, 128  ;;  %p906_p1 = scmp.lt.s32.totalorder %s30_s16, %s30_s16 }
   0x6   :  { %p902_p0 = scmp.ne.s32.totalorder %s30_s16, %s901_s19  ;;  %p907_p2 = scmp.lt.s32.totalorder %s901_s19, %s901_s19 }
   0x8   :  { %p908_p3 = por %p907_p2, %p906_p1 }
   0xa   :  { %p909_p4 = pnand %p908_p3, %p902_p0 }
   0xc   :  { %912 = shalt.err (!%p909_p4)
}
   0xd   :  { %32 = dma.hbm_to_vmem [thread:$0]  %s1071_s1, 128, %s30_s16, [#allocation6]  }
   0xe   :  { %s921_s22 = scalar_lea.vmem %s20_s18, 128  ;;  %p926_p6 = scmp.lt.s32.totalorder %s20_s18, %s20_s18 }
   0xf   :  { %p922_p5 = scmp.ne.s32.totalorder %s20_s18, %s921_s22  ;;  %p927_p7 = scmp.lt.s32.totalorder %s921_s22, %s921_s22 }
  0x11   :  { %p928_p8 = por %p927_p7, %p926_p6 }
  0x13   :  { %p929_p9 = pnand %p928_p8, %p922_p5 }
  0x15   :  { %932 = shalt.err (!%p929_p9)
}
  0x16   :  { %22 = dma.hbm_to_vmem [thread:$0]  %s1070_s0, 128, %s20_s18, [#allocation3]  }
  0x17   :  { %s1003_s25 = smov [#allocation7]   ;;  %s1004_s27 = smov [#allocation8]  }
  0x18   :  { %s39_s26 = sshll.u32 %s1003_s25, 4  ;;  %s49_s28 = sshll.u32 %s1004_s27, 4  ;;  %s40_s26 = int_to_ptr.vmem [resolvable:$true] %s39_s26  ;;  %s50_s28 = int_to_ptr.vmem [resolvable:$true] %s49_s28 }
  0x19   :  { %s941_s29 = scalar_lea.vmem %s40_s26, 128  ;;  %p946_p11 = scmp.lt.s32.totalorder %s40_s26, %s40_s26 }
  0x1a   :  { %p942_p10 = scmp.ne.s32.totalorder %s40_s26, %s941_s29  ;;  %p947_p12 = scmp.lt.s32.totalorder %s941_s29, %s941_s29 }
  0x1c   :  { %p948_p13 = por %p947_p12, %p946_p11 }
  0x1e   :  { %p949_p0 = pnand %p948_p13, %p942_p10 }
  0x20   :  { %952 = shalt.err (!%p949_p0)
}
  0x21   :  { %42 = dma.hbm_to_vmem [thread:$0]  %s1072_s2, 128, %s40_s26, [#allocation6]  }
  0x22   :  { %s961_s5 = scalar_lea.vmem %s50_s28, 128  ;;  %p966_p2 = scmp.lt.s32.totalorder %s50_s28, %s50_s28 }
  0x23   :  { %p962_p1 = scmp.ne.s32.totalorder %s50_s28, %s961_s5  ;;  %p967_p3 = scmp.lt.s32.totalorder %s961_s5, %s961_s5 }
  0x25   :  { %p968_p4 = por %p967_p3, %p966_p2 }
  0x27   :  { %p969_p5 = pnand %p968_p4, %p962_p1 }
  0x29   :  { %972 = shalt.err (!%p969_p5)
}
  0x2a   :  { %52 = dma.hbm_to_vmem [thread:$0]  %s1073_s3, 128, %s50_s28, [#allocation9]  }
  0x2b   :  { %993 = dma.done.wait [#allocation3], 128  }
  0x2c   :  { %994 = vsyncadd [#allocation3], 4294967168 }
  0x2d   :  { %995 = dma.done.wait [#allocation6], 256  }
  0x2e   :  { %996 = vsyncadd [#allocation6], 4294967040 }
  0x2f   :  { %997 = dma.done.wait [#allocation9], 128  }
  0x30   :  { %998 = vsyncadd [#allocation9], 4294967168  ;;  %v65_v0 = vld [vmem:[#allocation2] sm:$0xff]  ;;  %v67_v1 = vld [vmem:[#allocation7] sm:$0xff]  ;;  %v1005_v8 = vmov 0.0   ;;  %vm1006_vm0 = vmmov 0  }
  0x31   :  { %v66_v2 = vld [vmem:[#allocation5] sm:$0xff]  ;;  %v69_v3 = vmul.f32 %v65_v0, %v65_v0  ;;  %v419_v4 = vmul.f32 %v67_v1, %v67_v1  ;;  %v68_v5 = vld [vmem:[#allocation8] sm:$0xff]  ;;  %806 = vmatprep.subr.mxu0 %v1005_v8  ;;  %811 = vmatprep.subr.mxu1 %v1005_v8  ;;  %vm385_vm1 = vcmask 64512   ;;  %s1007_s2 = smov [#allocation10]   ;;  %vm771_vm2 = vcmask 0  }
  0x32   :  { %v75_v6 = vmul.f32 %v66_v2, %v66_v2  ;;  %v425_v7 = vmul.f32 %v68_v5, %v68_v5  ;;  %808 = vmatprep.mubr.msk.f32.mxu0 %vm1006_vm0, %v1005_v8  ;;  %813 = vmatprep.mubr.msk.f32.mxu1 %vm1006_vm0, %v1005_v8  ;;  %s779_s3 = sshll.u32 %s1007_s2, 4  ;;  %s780_s3 = int_to_ptr.vmem [resolvable:$true] %s779_s3 }
  0x33   :  { %70 = vadd.xlane.f32.xlu0 %v69_v3  ;;  %420 = vadd.xlane.f32.xlu1 %v419_v4  ;;  %s973_s7 = scalar_lea.vmem %s780_s3, 16  ;;  %s977_s8 = scalar_lea.vmem %s780_s3, 32 }
  0x34   :  { %p974_p6 = scmp.ne.s32.totalorder %s780_s3, %s973_s7  ;;  %p978_p7 = scmp.lt.s32.totalorder %s780_s3, %s780_s3 }
  0x35   :  { %p979_p8 = scmp.lt.s32.totalorder %s977_s8, %s973_s7 }
  0x37   :  { %76 = vadd.xlane.f32.xlu0 %v75_v6  ;;  %426 = vadd.xlane.f32.xlu1 %v425_v7  ;;  %p980_p9 = por %p979_p8, %p978_p7 }
  0x39   :  { %p981_p10 = pnand %p980_p9, %p974_p6 }
  0xbc   :  { %v71_v9 = vpop.xlane.xlu0 %70  ;;  %v421_v10 = vpop.xlane.xlu1 %420 }
  0xbd   :  { %v72_v11 = vmax.f32 %v71_v9, 1e-24  ;;  %v422_v12 = vmax.f32 %v421_v10, 1e-24 }
  0xbf   :  { %853 = vrsqrt.f32 %v72_v11 }
  0xc0   :  { %855 = vrsqrt.f32 %v422_v12  ;;  %v77_v13 = vpop.xlane.xlu0 %76  ;;  %v427_v14 = vpop.xlane.xlu1 %426 }
  0xc1   :  { %v78_v15 = vmax.f32 %v77_v13, 1e-24  ;;  %v428_v16 = vmax.f32 %v427_v14, 1e-24 }
  0xc3   :  { %857 = vrsqrt.f32 %v78_v15 }
  0xc4   :  { %859 = vrsqrt.f32 %v428_v16 }
  0xcc   :  { %v854_v17 = vpop.eup %853 }
  0xcd   :  { %v856_v18 = vpop.eup %855  ;;  %v74_v19 = vmul.f32 %v854_v17, %v65_v0 }
  0xce   :  { %v424_v22 = vmul.f32 %v856_v18, %v67_v1 }
  0xcf   :  { %807 = vmatpush3.xpose.msra.mxu0 %v74_v19  ;;  %v373_v20 = vmul.f32 %v74_v19, %v74_v19 }
  0xd0   :  { %v858_v21 = vpop.eup %857  ;;  %816 = vmatprep.subr.mxu0 %v1005_v8  ;;  %v723_v28 = vmul.f32 %v424_v22, %v424_v22 }
  0xd1   :  { %v860_v23 = vpop.eup %859  ;;  %v80_v24 = vmul.f32 %v858_v21, %v66_v2  ;;  %374 = vadd.xlane.f32.xlu0 %v373_v20 }
  0xd2   :  { %v430_v25 = vmul.f32 %v860_v23, %v68_v5  ;;  %809 = vmatmul.mubr.f32.vlgmr.msra.gmra.mxu0 %v74_v19 }
  0xd3   :  { %812 = vmatpush3.xpose.msra.mxu1 %v80_v24  ;;  %817 = vmatpush3.xpose.msra.mxu0 %v74_v19  ;;  %v379_v26 = vmul.f32 %v80_v24, %v80_v24  ;;  %v1047_v27 = vmul.f32 %v80_v24, %v74_v19 }
  0xd4   :  { %818 = vmatprep.mubr.msk.f32.mxu0 %vm1006_vm0, %v1005_v8  ;;  %821 = vmatprep.subr.mxu1 %v1005_v8  ;;  %v1050_v29 = vmul.f32 %v430_v25, %v424_v22  ;;  %v729_v30 = vmul.f32 %v430_v25, %v430_v25 }
  0xd5   :  { %380 = vadd.xlane.f32.xlu1 %v379_v26  ;;  %826 = vmatprep.subr.mxu0 %v1005_v8 }
  0xd6   :  { %814 = vmatmul.mubr.f32.vlgmr.msra.gmra.mxu1 %v74_v19  ;;  %819 = vmatmul.mubr.f32.vlgmr.msra.gmra.mxu0 %v80_v24 }
  0xd7   :  { %822 = vmatpush3.xpose.msra.mxu1 %v80_v24  ;;  %827 = vmatpush3.xpose.msra.mxu0 %v424_v22 }
  0xd8   :  { %724 = vadd.xlane.f32.xlu0 %v723_v28  ;;  %823 = vmatprep.mubr.msk.f32.mxu1 %vm1006_vm0, %v1005_v8 }
  0xd9   :  { %828 = vmatprep.mubr.msk.f32.mxu0 %vm1006_vm0, %v1005_v8  ;;  %831 = vmatprep.subr.mxu1 %v1005_v8 }
  0xda   :  { %824 = vmatmul.mubr.f32.vlgmr.msra.gmra.mxu1 %v80_v24  ;;  %829 = vmatmul.mubr.f32.vlgmr.msra.gmra.mxu0 %v424_v22 }
  0xdb   :  { %836 = vmatprep.subr.mxu0 %v1005_v8  ;;  %832 = vmatpush3.xpose.msra.mxu1 %v430_v25 }
  0xdc   :  { %837 = vmatpush3.xpose.msra.mxu0 %v424_v22  ;;  %730 = vadd.xlane.f32.xlu1 %v729_v30 }
  0xdd   :  { %833 = vmatprep.mubr.msk.f32.mxu1 %vm1006_vm0, %v1005_v8  ;;  %838 = vmatprep.mubr.msk.f32.mxu0 %vm1006_vm0, %v1005_v8 }
  0xde   :  { %834 = vmatmul.mubr.f32.vlgmr.msra.gmra.mxu1 %v424_v22  ;;  %841 = vmatprep.subr.mxu1 %v1005_v8 }
  0xdf   :  { %839 = vmatmul.mubr.f32.vlgmr.msra.gmra.mxu0 %v430_v25  ;;  %842 = vmatpush3.xpose.msra.mxu1 %v430_v25 }
  0xe0   :  { %843 = vmatprep.mubr.msk.f32.mxu1 %vm1006_vm0, %v1005_v8 }
  0xe2   :  { %844 = vmatmul.mubr.f32.vlgmr.msra.gmra.mxu1 %v430_v25 }
 0x15a   :  { %v375_v15 = vpop.xlane.xlu0 %374 }
 0x15b   :  { %v376_v16 = vmul.f32 1.4285715, %v375_v15 }
 0x15d   :  { %v377_v18 = vmul.f32 1.442695, %v376_v16 }
 0x15e   :  { %v381_v17 = vpop.xlane.xlu1 %380 }
 0x15f   :  { %v382_v19 = vmul.f32 1.4285715, %v381_v17 }
 0x161   :  { %v725_v20 = vpop.xlane.xlu0 %724  ;;  %v383_v21 = vmul.f32 1.442695, %v382_v19 }
 0x162   :  { %v726_v22 = vmul.f32 1.4285715, %v725_v20 }
 0x164   :  { %v727_v24 = vmul.f32 1.442695, %v726_v22 }
 0x165   :  { %v731_v23 = vpop.xlane.xlu1 %730 }
 0x166   :  { %v732_v25 = vmul.f32 1.4285715, %v731_v23 }
 0x168   :  { %v733_v28 = vmul.f32 1.442695, %v732_v25 }
 0x192   :  { %v147_v31 = vpop.f32.mrf.mxu0 }
 0x193   :  { %v151_v32 = vmul.f32 1.4285715, %v147_v31 }
 0x194   :  { %v810_v33 = vpop.f32.mrf.mxu0 }
 0x195   :  { %v152_v34 = vmul.f32 1.442695, %v151_v32 }
 0x196   :  { %v220_v35 = vpop.f32.mrf.mxu1  ;;  %v293_v36 = vpop.f32.mrf.mxu0 }
 0x197   :  { %861 = vpow2.f32 %v152_v34  ;;  %v224_v37 = vmul.f32 1.4285715, %v220_v35  ;;  %v297_v38 = vmul.f32 1.4285715, %v293_v36 }
 0x198   :  { %v815_v39 = vpop.f32.mrf.mxu1  ;;  %v820_v40 = vpop.f32.mrf.mxu0 }
 0x199   :  { %v225_v41 = vmul.f32 1.442695, %v224_v37  ;;  %v298_v42 = vmul.f32 1.442695, %v297_v38 }
 0x19a   :  { %v366_v43 = vpop.f32.mrf.mxu1  ;;  %v497_v44 = vpop.f32.mrf.mxu0 }
 0x19b   :  { %863 = vpow2.f32 %v225_v41  ;;  %v370_v45 = vmul.f32 1.4285715, %v366_v43  ;;  %v501_v46 = vmul.f32 1.4285715, %v497_v44 }
 0x19c   :  { %865 = vpow2.f32 %v298_v42  ;;  %v825_v47 = vpop.f32.mrf.mxu1  ;;  %v830_v48 = vpop.f32.mrf.mxu0 }
 0x19d   :  { %v371_v49 = vmul.f32 1.442695, %v370_v45  ;;  %v502_v50 = vmul.f32 1.442695, %v501_v46 }
 0x19e   :  { %v570_v51 = vpop.f32.mrf.mxu1 }
 0x19f   :  { %867 = vpow2.f32 %v371_v49  ;;  %v574_v52 = vmul.f32 1.4285715, %v570_v51  ;;  %v643_v53 = vpop.f32.mrf.mxu0 }
 0x1a0   :  { %869 = vpow2.f32 %v502_v50  ;;  %v647_v54 = vmul.f32 1.4285715, %v643_v53  ;;  %v835_v55 = vpop.f32.mrf.mxu1 }
 0x1a1   :  { %v575_v56 = vmul.f32 1.442695, %v574_v52  ;;  %v840_v57 = vpop.f32.mrf.mxu0 }
 0x1a2   :  { %v648_v58 = vmul.f32 1.442695, %v647_v54  ;;  %v716_v59 = vpop.f32.mrf.mxu1 }
 0x1a3   :  { %871 = vpow2.f32 %v575_v56  ;;  %v720_v60 = vmul.f32 1.4285715, %v716_v59 }
 0x1a4   :  { %v862_v61 = vpop.eup %861  ;;  %873 = vpow2.f32 %v648_v58  ;;  %v845_v62 = vpop.f32.mrf.mxu1 }
 0x1a5   :  { %v721_v63 = vmul.f32 1.442695, %v720_v60  ;;  %v386_v0 = vsel %vm385_vm1, %v862_v61, 0.0 }
 0x1a6   :  { %387 = vadd.xlane.f32.xlu0 %v386_v0 }
 0x1a7   :  { %875 = vpow2.f32 %v721_v63 }
 0x1a8   :  { %v864_v1 = vpop.eup %863  ;;  %877 = vpow2.f32 %v377_v18 }
 0x1a9   :  { %v866_v2 = vpop.eup %865  ;;  %v389_v3 = vsel %vm385_vm1, %v864_v1, 0.0  ;;  %879 = vpow2.f32 %v383_v21 }
 0x1aa   :  { %v394_v4 = vsel %vm385_vm1, %v866_v2, 0.0  ;;  %390 = vadd.xlane.f32.xlu1 %v389_v3  ;;  %881 = vpow2.f32 %v727_v24 }
 0x1ab   :  { %395 = vadd.xlane.f32.xlu0 %v394_v4  ;;  %883 = vpow2.f32 %v733_v28 }
 0x1ac   :  { %v868_v5 = vpop.eup %867 }
 0x1ad   :  { %v870_v6 = vpop.eup %869  ;;  %v397_v7 = vsel %vm385_vm1, %v868_v5, 0.0 }
 0x1ae   :  { %v735_v8 = vsel %vm385_vm1, %v870_v6, 0.0  ;;  %398 = vadd.xlane.f32.xlu1 %v397_v7 }
 0x1af   :  { %736 = vadd.xlane.f32.xlu0 %v735_v8 }
 0x1b0   :  { %v872_v9 = vpop.eup %871 }
 0x1b1   :  { %v874_v10 = vpop.eup %873  ;;  %v738_v11 = vsel %vm385_vm1, %v872_v9, 0.0 }
 0x1b2   :  { %v743_v12 = vsel %vm385_vm1, %v874_v10, 0.0  ;;  %739 = vadd.xlane.f32.xlu1 %v738_v11 }
 0x1b3   :  { %744 = vadd.xlane.f32.xlu0 %v743_v12 }
 0x1b4   :  { %v876_v13 = vpop.eup %875 }
 0x1b5   :  { %v746_v14 = vsel %vm385_vm1, %v876_v13, 0.0  ;;  %v878_v31 = vpop.eup %877 }
 0x1b6   :  { %747 = vadd.xlane.f32.xlu1 %v746_v14  ;;  %v880_v35 = vpop.eup %879 }
 0x1b7   :  { %403 = vadd.xlane.f32.xlu0 %v1047_v27  ;;  %v882_v40 = vpop.eup %881 }
 0x1b8   :  { %v884_v45 = vpop.eup %883 }
 0x1ba   :  { %752 = vadd.xlane.f32.xlu1 %v1050_v29 }
 0x22f   :  { %v388_v26 = vpop.xlane.xlu0 %387 }
 0x233   :  { %v391_v30 = vpop.xlane.xlu1 %390 }
 0x234   :  { %v392_v27 = vadd.f32 %v391_v30, %v388_v26  ;;  %v396_v29 = vpop.xlane.xlu0 %395 }
 0x236   :  { %v393_v32 = vsub.f32 %v392_v27, %v878_v31 }
 0x237   :  { %v399_v33 = vpop.xlane.xlu1 %398 }
 0x238   :  { %v400_v34 = vadd.f32 %v399_v33, %v396_v29  ;;  %v737_v36 = vpop.xlane.xlu0 %736  ;;  %885 = vlog2.f32 %v393_v32 }
 0x23a   :  { %v401_v37 = vsub.f32 %v400_v34, %v880_v35 }
 0x23b   :  { %v740_v38 = vpop.xlane.xlu1 %739 }
 0x23c   :  { %887 = vlog2.f32 %v401_v37  ;;  %v741_v39 = vadd.f32 %v740_v38, %v737_v36  ;;  %v745_v42 = vpop.xlane.xlu0 %744 }
 0x23e   :  { %v742_v41 = vsub.f32 %v741_v39, %v882_v40 }
 0x23f   :  { %v748_v43 = vpop.xlane.xlu1 %747 }
 0x240   :  { %v749_v44 = vadd.f32 %v748_v43, %v745_v42  ;;  %889 = vlog2.f32 %v742_v41  ;;  %v404_v47 = vpop.xlane.xlu0 %403 }
 0x241   :  { %v405_v49 = vmul.f32 1.4285715, %v404_v47 }
 0x242   :  { %v750_v46 = vsub.f32 %v749_v44, %v884_v45 }
 0x243   :  { %v411_v54 = vmul.f32 2.0, %v405_v49  ;;  %v753_v55 = vpop.xlane.xlu1 %752 }
 0x244   :  { %891 = vlog2.f32 %v750_v46  ;;  %v754_v59 = vmul.f32 1.4285715, %v753_v55 }
 0x245   :  { %v886_v48 = vpop.eup %885 }
 0x246   :  { %v407_v51 = vmul.f32 0.6931472, %v886_v48  ;;  %v760_v1 = vmul.f32 2.0, %v754_v59 }
 0x249   :  { %v888_v50 = vpop.eup %887 }
 0x24a   :  { %v409_v52 = vmul.f32 0.6931472, %v888_v50 }
 0x24c   :  { %v410_v53 = vadd.f32 %v409_v52, %v407_v51 }
 0x24d   :  { %v890_v57 = vpop.eup %889 }
 0x24e   :  { %v412_v56 = vsub.f32 %v410_v53, %v411_v54  ;;  %v756_v62 = vmul.f32 0.6931472, %v890_v57 }
 0x250   :  { %v413_v58 = vrot.slane %v412_v56, 4 }
 0x251   :  { %v892_v60 = vpop.eup %891 }
 0x252   :  { %v414_v61 = vadd.f32 %v413_v58, %v412_v56  ;;  %v758_v63 = vmul.f32 0.6931472, %v892_v60 }
 0x254   :  { %v759_v0 = vadd.f32 %v758_v63, %v756_v62  ;;  %v415_v2 = vrot.slane %v414_v61, 2 }
 0x256   :  { %v761_v3 = vsub.f32 %v759_v0, %v760_v1  ;;  %v416_v5 = vadd.f32 %v415_v2, %v414_v61 }
 0x258   :  { %v762_v4 = vrot.slane %v761_v3, 4  ;;  %v417_v8 = vrot.slane %v416_v5, 1 }
 0x25a   :  { %v763_v6 = vadd.f32 %v762_v4, %v761_v3  ;;  %v418_v11 = vadd.f32 %v417_v8, %v416_v5 }
 0x25c   :  { %v764_v7 = vrot.slane %v763_v6, 2 }
 0x25e   :  { %v765_v9 = vadd.f32 %v764_v7, %v763_v6 }
 0x260   :  { %v766_v10 = vrot.slane %v765_v9, 1 }
 0x262   :  { %v767_v12 = vadd.f32 %v766_v10, %v765_v9 }
 0x264   :  { %v768_v13 = vadd.f32 %v767_v12, %v418_v11 }
 0x266   :  { %v769_v14 = vmul.f32 0.5, %v768_v13 }
 0x268   :  { %v770_v15 = vmul.f32 0.0625, %v769_v14 }
 0x26a   :  { %772 = vst.msk [vmem:[#allocation10] sm:$0x1] %vm771_vm2, %v770_v15 }
 0x26b   :  { %984 = shalt.err (!%p981_p10)
}
 0x26c   :  { %782 = dma.vmem_to_hbm [thread:$0]  %s780_s3, 16, %s1074_s4, [#allocation4]  }
 0x26d   :  { %999 = dma.done.wait [#allocation4], 16  }
 0x26e   :  { %1000 = vsyncadd [#allocation4], 4294967280 }
 0x26f   :  { %786 = vsyncpa [#allocation3], 1 }
 0x270   :  { %787 = vsyncpa [#allocation6], 1 }
 0x271   :  { %788 = vsyncpa [#allocation9], 1 }
 0x272   :  { %789 = vsyncpa [#allocation4], 1 }

</bundles_post_ra>
